<compile_context>
chip_gen: v6e
topology: v6e:2x2x1
jax: 0.10.0
libtpu: 0.0.40
codegen_flags: <defaults>
</compile_context>

<pallas_src>
import functools

import jax
import jax.numpy as jnp
from jax.experimental import pallas as pl
from jax.experimental.pallas import tpu as pltpu

BN_EPS = 1e-5

# Buffer count for grid-invariant operands (weights / biases). 1 = single buffer
# (their block never changes, so double-buffering only wastes VMEM). Mutated to 2
# at runtime if pl.Buffered(1) is not supported by this jax/libtpu build.
_WEIGHT_BUFFERS = [1]


def _round_up(v, m):
    return ((v + m - 1) // m) * m


# --------------------------------------------------------------------------- #
# Kernels
# --------------------------------------------------------------------------- #
def _fused_kernel(x_ref, w_ref, b_ref, o_ref):
    # y = x @ W_eff + b_eff : whole affine chain collapsed to one MXU matmul.
    # f32 -> bf16 cast of x happens here (cheap VPU pack hidden under the MXU).
    y = jnp.dot(x_ref[...].astype(w_ref.dtype), w_ref[...],
                preferred_element_type=jnp.float32)
    o_ref[...] = (y + b_ref[...]).astype(o_ref.dtype)


def _two_stage_kernel(x_ref, w1_ref, w2_ref, b2_ref, o_ref):
    # y = (x @ W1') @ W2 + b_eff : BN folded into W1', b1 folded into b_eff,
    # so no intermediate bias add -- two MXU matmuls with f32 accumulation.
    h = jnp.dot(x_ref[...].astype(w1_ref.dtype), w1_ref[...],
                preferred_element_type=jnp.float32)
    y = jnp.dot(h.astype(w2_ref.dtype), w2_ref[...],
                preferred_element_type=jnp.float32)
    o_ref[...] = (y + b2_ref[...]).astype(o_ref.dtype)


# --------------------------------------------------------------------------- #
# Spec / tiling helpers
# --------------------------------------------------------------------------- #
def _resident_spec(shape, weight_buffers):
    """BlockSpec for a grid-invariant operand (index_map -> all-zeros block)."""
    index_map = lambda i: (0,) * len(shape)
    if weight_buffers == 1:
        # Single buffer: block never changes, so pipelining is not lost and the
        # resident-weight VMEM footprint is halved (matters on v7x's 64 MiB VMEM).
        return pl.BlockSpec(shape, index_map, pipeline_mode=pl.Buffered(1))
    return pl.BlockSpec(shape, index_map)


def _batch_tiling(B, block_b):
    """Pick a batch tile TB (8-aligned) and grid size nb = cdiv(B, TB)."""
    Bv = _round_up(B, 8)
    TB = min(block_b, Bv)
    if TB == Bv and B > 8:
        # Split into >= 2 grid steps so the "parallel" batch axis can shard across
        # v7x's two TensorCores (no effect on single-TC v5e/v6e).
        TB = max(8, _round_up(pl.cdiv(B, 2), 8))
    nb = pl.cdiv(B, TB)
    return TB, nb


def _vmem_limit(block_bytes):
    """block_bytes already includes per-operand buffering; add small headroom
    and clamp to ~80% of this generation's physical VMEM."""
    try:
        cap = pltpu.get_tpu_info().vmem_capacity_bytes
    except Exception:  # unknown platform / interpret mode
        cap = 64 << 20
    return int(min(max(block_bytes + (2 << 20), 16 << 20), int(cap * 0.8)))


# --------------------------------------------------------------------------- #
# One-time weight preparation (hoisted out of the per-call path)
# --------------------------------------------------------------------------- #
def prepare_params(params, *, fuse=None):
    """Fold eval-mode BN into the hidden linear, fold b1 through the classifier
    (exact: no ReLU between the linears), optionally collapse the whole affine
    chain when class_num <= linear, then pad to lane-dense (x128) shapes and
    cast matmul operands to bf16 -- all once, outside the per-call path."""
    w1, b1 = params["w1"], params["b1"]
    gamma, beta = params["gamma"], params["beta"]
    mean, var = params["mean"], params["var"]
    w2, b2 = params["w2"], params["b2"]
    D, L = w1.shape
    C = w2.shape[1]

    scale = gamma * jax.lax.rsqrt(var + BN_EPS)          # (1, L)
    w1f = w1 * scale                                     # (D, L)  BN folded into W1
    b1f = (b1 - mean) * scale + beta                     # (1, L)  BN-folded hidden bias
    b2f = b1f @ w2 + b2                                  # (1, C)  b1 folded through W2

    if fuse is None:
        fuse = C <= L
    Cp = _round_up(C, 128)

    if fuse:
        # Collapse (Linear + BN) o Linear into a single affine map: one matmul,
        # FLOPs drop from 2B*L*(D+C) to 2B*D*C.
        w_eff = w1f @ w2                                 # (D, C), computed in f32
        w_p = jnp.zeros((D, Cp), jnp.float32).at[:, :C].set(w_eff).astype(jnp.bfloat16)
        b_p = jnp.zeros((1, Cp), jnp.float32).at[:, :C].set(b2f)
        return {"mode": "fused", "w": w_p, "b": b_p, "class_num": C}

    Lp = _round_up(L, 128)
    w1p = jnp.zeros((D, Lp), jnp.float32).at[:, :L].set(w1f).astype(jnp.bfloat16)
    w2p = jnp.zeros((Lp, Cp), jnp.float32).at[:L, :C].set(w2).astype(jnp.bfloat16)
    b2p = jnp.zeros((1, Cp), jnp.float32).at[:, :C].set(b2f)
    return {"mode": "two_stage", "w1": w1p, "w2": w2p, "b2": b2p, "class_num": C}


# --------------------------------------------------------------------------- #
# Forward implementations
# --------------------------------------------------------------------------- #
@functools.partial(jax.jit, static_argnames=("class_num", "block_b", "weight_buffers"))
def _forward_fused(x, w, b, *, class_num, block_b, weight_buffers):
    B, D = x.shape
    Cp = w.shape[1]
    TB, nb = _batch_tiling(B, block_b)
    Bo = nb * TB

    wb = weight_buffers
    block_bytes = (2 * TB * D * 4                 # x tile (f32), double-buffered
                   + 2 * TB * Cp * 4              # out tile (f32), double-buffered
                   + wb * (D * Cp * 2 + Cp * 4))  # resident W_eff (bf16) + bias (f32)
    cost = pl.CostEstimate(
        flops=2 * Bo * D * Cp, transcendentals=0,
        bytes_accessed=B * D * 4 + D * Cp * 2 + Cp * 4 + Bo * Cp * 4)

    out = pl.pallas_call(
        _fused_kernel,
        out_shape=jax.ShapeDtypeStruct((Bo, Cp), jnp.float32),
        grid=(nb,),
        in_specs=[
            pl.BlockSpec((TB, D), lambda i: (i, 0)),       # x: f32, tiled over batch
            _resident_spec((D, Cp), wb),                   # W_eff
            _resident_spec((1, Cp), wb),                   # b_eff
        ],
        out_specs=pl.BlockSpec((TB, Cp), lambda i: (i, 0)),
        compiler_params=pltpu.CompilerParams(
            dimension_semantics=("parallel",),
            vmem_limit_bytes=_vmem_limit(block_bytes)),
        cost_estimate=cost,
    )(x, w, b)
    # Slice away batch / class padding (kept f32 for module-faithful logits).
    return out[:B, :class_num]


@functools.partial(jax.jit, static_argnames=("class_num", "block_b", "weight_buffers"))
def _forward_two_stage(x, w1, w2, b2, *, class_num, block_b, weight_buffers):
    B, D = x.shape
    Lp = w1.shape[1]
    Cp = w2.shape[1]
    TB, nb = _batch_tiling(B, block_b)
    Bo = nb * TB

    wb = weight_buffers
    block_bytes = (2 * TB * D * 4 + 2 * TB * Cp * 4
                   + wb * (D * Lp * 2 + Lp * Cp * 2 + Cp * 4))
    cost = pl.CostEstimate(
        flops=2 * Bo * (D * Lp + Lp * Cp), transcendentals=0,
        bytes_accessed=B * D * 4 + D * Lp * 2 + Lp * Cp * 2 + Cp * 4 + Bo * Cp * 4)

    out = pl.pallas_call(
        _two_stage_kernel,
        out_shape=jax.ShapeDtypeStruct((Bo, Cp), jnp.float32),
        grid=(nb,),
        in_specs=[
            pl.BlockSpec((TB, D), lambda i: (i, 0)),       # x: f32, tiled over batch
            _resident_spec((D, Lp), wb),                   # W1' (BN folded)
            _resident_spec((Lp, Cp), wb),                  # W2
            _resident_spec((1, Cp), wb),                   # b_eff = b1' @ W2 + b2
        ],
        out_specs=pl.BlockSpec((TB, Cp), lambda i: (i, 0)),
        compiler_params=pltpu.CompilerParams(
            dimension_semantics=("parallel",),
            vmem_limit_bytes=_vmem_limit(block_bytes)),
        cost_estimate=cost,
    )(x, w1, w2, b2)
    return out[:B, :class_num]


def classblock_forward(x, prepared, *, block_b=512):
    """x: (B, input_dim) float32.  prepared: output of prepare_params()."""
    C = prepared["class_num"]
    if prepared["mode"] == "fused":
        call = lambda wb: _forward_fused(
            x, prepared["w"], prepared["b"],
            class_num=C, block_b=block_b, weight_buffers=wb)
    else:
        call = lambda wb: _forward_two_stage(
            x, prepared["w1"], prepared["w2"], prepared["b2"],
            class_num=C, block_b=block_b, weight_buffers=wb)
    try:
        return call(_WEIGHT_BUFFERS[0])
    except Exception:
        if _WEIGHT_BUFFERS[0] == 2:
            raise
        # pl.Buffered(1) not supported on this build: fall back (once) to the
        # default double-buffering for the invariant operands.
        _WEIGHT_BUFFERS[0] = 2
        return call(2)


# --------------------------------------------------------------------------- #
# Parameter init (mirrors weights_init_kaiming / weights_init_classifier) & ref
# --------------------------------------------------------------------------- #
def init_params(key, input_dim, linear, class_num):
    k1, k2, k3 = jax.random.split(key, 3)
    # Linear(input_dim, linear): kaiming_normal a=0, mode='fan_out' -> std sqrt(2/linear)
    w1 = jax.random.normal(k1, (input_dim, linear), jnp.float32) * jnp.sqrt(2.0 / linear)
    b1 = jnp.zeros((1, linear), jnp.float32)
    # BatchNorm1d(linear): weight ~ N(1, 0.02), bias 0; running stats 0 / 1
    gamma = 1.0 + 0.02 * jax.random.normal(k2, (1, linear), jnp.float32)
    beta = jnp.zeros((1, linear), jnp.float32)
    mean = jnp.zeros((1, linear), jnp.float32)
    var = jnp.ones((1, linear), jnp.float32)
    # classifier Linear(linear, class_num): weight ~ N(0, 0.001), bias 0
    w2 = 0.001 * jax.random.normal(k3, (linear, class_num), jnp.float32)
    b2 = jnp.zeros((1, class_num), jnp.float32)
    return dict(w1=w1, b1=b1, gamma=gamma, beta=beta, mean=mean, var=var,
                w2=w2, b2=b2)


def classblock_ref(x, p):
    """Pure-JAX f32 reference (eval-mode module semantics)."""
    h = x @ p["w1"] + p["b1"]
    h = (h - p["mean"]) * (p["gamma"] / jnp.sqrt(p["var"] + BN_EPS)) + p["beta"]
    return h @ p["w2"] + p["b2"]


if __name__ == "__main__":
    key = jax.random.PRNGKey(0)
    kx, kp = jax.random.split(key)

    B, INPUT_DIM, LINEAR, CLASS_NUM = 8, 64, 128, 32
    x = jax.random.normal(kx, (B, INPUT_DIM), jnp.float32)
    params = init_params(kp, INPUT_DIM, LINEAR, CLASS_NUM)
    ref = classblock_ref(x, params)

    # Fused path (class_num <= linear): whole affine chain = one MXU matmul.
    prepared_fused = prepare_params(params)
    out_fused = jax.block_until_ready(classblock_forward(x, prepared_fused))

    # Two-stage path (used when class_num > linear): two MXU matmuls.
    prepared_two = prepare_params(params, fuse=False)
    out_two = jax.block_until_ready(classblock_forward(x, prepared_two))

    for name, out in (("fused", out_fused), ("two_stage", out_two)):
        assert out.shape == (B, CLASS_NUM), (name, out.shape)
        err = float(jnp.max(jnp.abs(out - ref)))
        # bf16 matmul operands with f32 accumulation -> loosened tolerance vs f32 ref.
        assert jnp.allclose(out, ref, atol=2e-3, rtol=2e-2), (
            "%s mismatch vs reference; max abs diff = %f" % (name, err))

    print("KERNEL_OK")
</pallas_src>

<mosaic_0001>
module attributes {stable_mosaic.version = 11 : i64} {
  func.func @_fused_kernel(%arg0: i32, %arg1: memref<8x64xf32, #tpu.memory_space<vmem>>, %arg2: memref<64x128xbf16, #tpu.memory_space<vmem>>, %arg3: memref<1x128xf32, #tpu.memory_space<vmem>>, %arg4: memref<8x128xf32, #tpu.memory_space<vmem>>) attributes {dimension_semantics = [#tpu.dimension_semantics<parallel>], iteration_bounds = array<i64: 1>, scalar_prefetch = 0 : i64, scratch_operands = 0 : i64, tpu.core_type = #tpu.core_type<tc>, window_params = [{transform_indices = @transform_0, window_bounds = array<i64: 8, 64>}, {pipeline_mode = #tpu.pipeline_mode<synchronous>, transform_indices = @transform_1, window_bounds = array<i64: 64, 128>}, {pipeline_mode = #tpu.pipeline_mode<synchronous>, transform_indices = @transform_2, window_bounds = array<i64: 1, 128>}, {transform_indices = @transform_3, window_bounds = array<i64: 8, 128>}]} {
    %c0 = arith.constant 0 : index
    %c0_0 = arith.constant 0 : index
    %0 = vector.load %arg1[%c0, %c0_0] : memref<8x64xf32, #tpu.memory_space<vmem>>, vector<8x64xf32>
    %1 = arith.truncf %0 : vector<8x64xf32> to vector<8x64xbf16>
    %c0_1 = arith.constant 0 : index
    %c0_2 = arith.constant 0 : index
    %2 = vector.load %arg2[%c0_1, %c0_2] : memref<64x128xbf16, #tpu.memory_space<vmem>>, vector<64x128xbf16>
    %cst = arith.constant dense<0.000000e+00> : vector<8x128xf32>
    %3 = tpu.matmul %1, %2, %cst {dimension_numbers = #tpu.dot_dimension_numbers<[1], [0], [0], [1], [0, 0, 1, 1], [], []>} : vector<8x64xbf16>, vector<64x128xbf16>, vector<8x128xf32> -> vector<8x128xf32>
    %c0_3 = arith.constant 0 : index
    %c0_4 = arith.constant 0 : index
    %4 = vector.load %arg3[%c0_3, %c0_4] : memref<1x128xf32, #tpu.memory_space<vmem>>, vector<1x128xf32>
    %5 = vector.broadcast %4 : vector<1x128xf32> to vector<8x128xf32>
    %6 = arith.addf %3, %5 : vector<8x128xf32>
    %c0_5 = arith.constant 0 : index
    %c0_6 = arith.constant 0 : index
    %7 = vector.load %arg4[%c0_5, %c0_6] : memref<8x128xf32, #tpu.memory_space<vmem>>, vector<8x128xf32>
    tpu.vector_store %arg4[%c0_5, %c0_6], %6 {strides = array<i32>} : memref<8x128xf32, #tpu.memory_space<vmem>>, vector<8x128xf32>,
    return
  }
  func.func @transform_0(%arg0: i32) -> (i32, i32) {
    %c0_i32 = arith.constant 0 : i32
    %c0_i32_0 = arith.constant 0 : i32
    return %arg0, %c0_i32 : i32, i32
  }
  func.func @transform_1(%arg0: i32) -> (i32, i32) {
    %c0_i32 = arith.constant 0 : i32
    %c0_i32_0 = arith.constant 0 : i32
    %c0_i32_1 = arith.constant 0 : i32
    return %c0_i32, %c0_i32_0 : i32, i32
  }
  func.func @transform_2(%arg0: i32) -> (i32, i32) {
    %c0_i32 = arith.constant 0 : i32
    %c0_i32_0 = arith.constant 0 : i32
    %c0_i32_1 = arith.constant 0 : i32
    return %c0_i32, %c0_i32_0 : i32, i32
  }
  func.func @transform_3(%arg0: i32) -> (i32, i32) {
    %c0_i32 = arith.constant 0 : i32
    %c0_i32_0 = arith.constant 0 : i32
    return %arg0, %c0_i32 : i32, i32
  }
}

module attributes {stable_mosaic.version = 11 : i64} {
  func.func @_fused_kernel(%arg0: i32, %arg1: memref<8x64xf32, #tpu.memory_space<vmem>>, %arg2: memref<64x128xbf16, #tpu.memory_space<vmem>>, %arg3: memref<1x128xf32, #tpu.memory_space<vmem>>, %arg4: memref<8x128xf32, #tpu.memory_space<vmem>>) attributes {dimension_semantics = [#tpu.dimension_semantics<parallel>], iteration_bounds = array<i64: 1>, scalar_prefetch = 0 : i64, scratch_operands = 0 : i64, tpu.core_type = #tpu.core_type<tc>, window_params = [{transform_indices = @transform_0, window_bounds = array<i64: 8, 64>}, {pipeline_mode = #tpu.pipeline_mode<synchronous>, transform_indices = @transform_1, window_bounds = array<i64: 64, 128>}, {pipeline_mode = #tpu.pipeline_mode<synchronous>, transform_indices = @transform_2, window_bounds = array<i64: 1, 128>}, {transform_indices = @transform_3, window_bounds = array<i64: 8, 128>}]} {
    %c0 = arith.constant 0 : index
    %c0_0 = arith.constant 0 : index
    %0 = vector.load %arg1[%c0, %c0_0] : memref<8x64xf32, #tpu.memory_space<vmem>>, vector<8x64xf32>
    %1 = arith.truncf %0 : vector<8x64xf32> to vector<8x64xbf16>
    %c0_1 = arith.constant 0 : index
    %c0_2 = arith.constant 0 : index
    %2 = vector.load %arg2[%c0_1, %c0_2] : memref<64x128xbf16, #tpu.memory_space<vmem>>, vector<64x128xbf16>
    %cst = arith.constant dense<0.000000e+00> : vector<8x128xf32>
    %3 = tpu.matmul %1, %2, %cst {dimension_numbers = #tpu.dot_dimension_numbers<[1], [0], [0], [1], [0, 0, 1, 1], [], []>} : vector<8x64xbf16>, vector<64x128xbf16>, vector<8x128xf32> -> vector<8x128xf32>
    %c0_3 = arith.constant 0 : index
    %c0_4 = arith.constant 0 : index
    %4 = vector.load %arg3[%c0_3, %c0_4] : memref<1x128xf32, #tpu.memory_space<vmem>>, vector<1x128xf32>
    %5 = vector.broadcast %4 : vector<1x128xf32> to vector<8x128xf32>
    %6 = arith.addf %3, %5 : vector<8x128xf32>
    %c0_5 = arith.constant 0 : index
    %c0_6 = arith.constant 0 : index
    %7 = vector.load %arg4[%c0_5, %c0_6] : memref<8x128xf32, #tpu.memory_space<vmem>>, vector<8x128xf32>
    tpu.vector_store %arg4[%c0_5, %c0_6], %6 {strides = array<i32>} : memref<8x128xf32, #tpu.memory_space<vmem>>, vector<8x128xf32>,
    return
  }
  func.func @transform_0(%arg0: i32) -> (i32, i32) {
    %c0_i32 = arith.constant 0 : i32
    %c0_i32_0 = arith.constant 0 : i32
    return %arg0, %c0_i32 : i32, i32
  }
  func.func @transform_1(%arg0: i32) -> (i32, i32) {
    %c0_i32 = arith.constant 0 : i32
    %c0_i32_0 = arith.constant 0 : i32
    %c0_i32_1 = arith.constant 0 : i32
    return %c0_i32, %c0_i32_0 : i32, i32
  }
  func.func @transform_2(%arg0: i32) -> (i32, i32) {
    %c0_i32 = arith.constant 0 : i32
    %c0_i32_0 = arith.constant 0 : i32
    %c0_i32_1 = arith.constant 0 : i32
    return %c0_i32, %c0_i32_0 : i32, i32
  }
  func.func @transform_3(%arg0: i32) -> (i32, i32) {
    %c0_i32 = arith.constant 0 : i32
    %c0_i32_0 = arith.constant 0 : i32
    return %arg0, %c0_i32 : i32, i32
  }
}

</mosaic_0001>

<bundles_post_ra>
// kernel: _forward_fused.1
= control target key start
LH: loop header
LB: loop body
LE: loop exit
PB: predicated region body
PF: predicated region fallthrough
CT: control target
= control target key end

     0   :  { %8 = vsyncpa [#allocation3], 0  ;;  %s283_s0 = inlined_call_operand.hbm [shape: f32[8,64], index: 0, kind: input, shape index: {}]   ;;  %s284_s1 = inlined_call_operand.hbm [shape: bf16[64,128], index: 1, kind: input, shape index: {}]   ;;  %s285_s2 = inlined_call_operand.vmem [shape: f32[1,128], index: 2, kind: input, shape index: {}]   ;;  %s286_s3 = inlined_call_operand.hbm [shape: f32[8,128], index: 3, kind: output, shape index: {}]  }
   0x1   :  { %9 = vsyncpa [#allocation6], 0 }
   0x2   :  { %10 = vsyncpa [#allocation4], 0  ;;  %s244_s12 = smov [#allocation2]   ;;  %s245_s14 = smov [#allocation5]  }
   0x3   :  { %s17_s13 = sshll.u32 %s244_s12, 4  ;;  %s26_s15 = sshll.u32 %s245_s14, 4  ;;  %s18_s13 = int_to_ptr.vmem [resolvable:$true] %s17_s13  ;;  %s27_s15 = int_to_ptr.vmem [resolvable:$true] %s26_s15 }
   0x4   :  { %s186_s16 = scalar_lea.vmem %s18_s13, 128  ;;  %p191_p1 = scmp.lt.s32.totalorder %s18_s13, %s18_s13 }
   0x5   :  { %p187_p0 = scmp.ne.s32.totalorder %s18_s13, %s186_s16  ;;  %p192_p2 = scmp.lt.s32.totalorder %s186_s16, %s186_s16 }
   0x7   :  { %p193_p3 = por %p192_p2, %p191_p1 }
   0x9   :  { %p194_p4 = pnand %p193_p3, %p187_p0 }
   0xb   :  { %197 = shalt.err (!%p194_p4)
}
   0xc   :  { %20 = dma.hbm_to_vmem [thread:$0]  %s283_s0, 128, %s18_s13, [#allocation3]  }
   0xd   :  { %s206_s19 = scalar_lea.vmem %s27_s15, 512  ;;  %p211_p6 = scmp.lt.s32.totalorder %s27_s15, %s27_s15 }
   0xe   :  { %p207_p5 = scmp.ne.s32.totalorder %s27_s15, %s206_s19  ;;  %p212_p7 = scmp.lt.s32.totalorder %s206_s19, %s206_s19 }
  0x10   :  { %p213_p8 = por %p212_p7, %p211_p6 }
  0x12   :  { %p214_p9 = pnand %p213_p8, %p207_p5 }
  0x14   :  { %217 = shalt.err (!%p214_p9)
}
  0x15   :  { %s246_s20 = smov 64   ;;  %s247_s21 = smov 4  }
  0x16   :  { %32 = dma.hbm_to_vmem [thread:$0]  %s284_s1, 512, %s27_s15, [#allocation6], %s246_s20, %s246_s20, %s247_s21  }
  0x17   :  { %238 = dma.done.wait [#allocation3], 128  }
  0x18   :  { %239 = vsyncadd [#allocation3], 4294967168 }
  0x19   :  { %240 = dma.done.wait [#allocation6], 512  }
  0x1a   :  { %241 = vsyncadd [#allocation6], 4294966784  ;;  %v248_v0 = vmov 0.0   ;;  %vm249_vm0 = vmmov 0   ;;  %v174_v1 = vld [vmem:[#allocation5 + $0x18] sm:$0xff]   ;;  %v175_v2 = vld [vmem:[#allocation5 + $0x10] sm:$0xff]  }
  0x1b   :  { %155 = vmatprep.subr.bf16.mxu0 %v248_v0  ;;  %163 = vmatprep.mubr.msk.bf16.mxu0 %vm249_vm0, %v248_v0  ;;  %v176_v3 = vld [vmem:[#allocation5 + $0x8] sm:$0xff]   ;;  %v177_v4 = vld [vmem:[#allocation5] sm:$0xff]   ;;  %v42_v5 = vld [vmem:[#allocation2] sm:$0xff]  ;;  %vm83_vm1 = vcmask 523264   ;;  %s250_s24 = smov [#allocation7]  }
  0x1c   :  { %156 = vmatpush3.bf16.msra.mxu0 %v174_v1  ;;  %v43_v6 = vpack.c.bf16 %v42_v5, %v42_v5  ;;  %v144_v7 = vld [vmem:[%s285_s2] ss:$0 sm:$0xff]  ;;  %s134_s25 = sshll.u32 %s250_s24, 4  ;;  %s135_s25 = int_to_ptr.vmem [resolvable:$true] %s134_s25 }
  0x1d   :  { %157 = vmatprep.subr.bf16.mxu0 %v248_v0  ;;  %s218_s26 = scalar_lea.vmem %s135_s25, 128  ;;  %p223_p11 = scmp.lt.s32.totalorder %s135_s25, %s135_s25 }
  0x1e   :  { %p219_p10 = scmp.ne.s32.totalorder %s135_s25, %s218_s26  ;;  %p224_p12 = scmp.lt.s32.totalorder %s218_s26, %s218_s26 }
  0x20   :  { %158 = vmatpush3.bf16.msra.mxu0 %v175_v2  ;;  %p225_p13 = por %p224_p12, %p223_p11 }
  0x21   :  { %159 = vmatprep.subr.bf16.mxu0 %v248_v0 }
  0x22   :  { %p226_p0 = pnand %p225_p13, %p219_p10 }
  0x24   :  { %160 = vmatpush3.bf16.msra.mxu0 %v176_v3 }
  0x25   :  { %161 = vmatprep.subr.bf16.mxu0 %v248_v0 }
  0x28   :  { %162 = vmatpush3.bf16.msra.mxu0 %v177_v4 }
  0x2b   :  { %164 = vmatmul.mubr.msk.bf16.vlgmr.msra.gmra.mxu0 %vm83_vm1, %v43_v6 }
  0xeb   :  { %v121_v8 = vpop.f32.mrf.mxu0 }
  0xec   :  { %v122_v9 = vadd.f32 %v144_v7, %v121_v8 }
  0xed   :  { %v165_v10 = vpop.f32.mrf.mxu0 }
  0xee   :  { %127 = vst [vmem:[#allocation7] sm:$0xff] %v122_v9 }
  0xef   :  { %v124_v11 = vpop.f32.mrf.mxu0 }
  0xf0   :  { %229 = shalt.err (!%p226_p0)
}
  0xf1   :  { %137 = dma.vmem_to_hbm [thread:$0]  %s135_s25, 128, %s286_s3, [#allocation4]   ;;  %v166_v12 = vpop.f32.mrf.mxu0 }
  0xf2   :  { %242 = dma.done.wait [#allocation4], 128  }
  0xf3   :  { %243 = vsyncadd [#allocation4], 4294967168 }
  0xf4   :  { %141 = vsyncpa [#allocation3], 1 }
  0xf5   :  { %142 = vsyncpa [#allocation6], 1 }
  0xf6   :  { %143 = vsyncpa [#allocation4], 1 }

// kernel: _forward_fused.1
= control target key start
LH: loop header
LB: loop body
LE: loop exit
PB: predicated region body
PF: predicated region fallthrough
CT: control target
= control target key end

     0   :  { %8 = vsyncpa [#allocation3], 0  ;;  %s283_s0 = inlined_call_operand.hbm [shape: f32[8,64], index: 0, kind: input, shape index: {}]   ;;  %s284_s1 = inlined_call_operand.hbm [shape: bf16[64,128], index: 1, kind: input, shape index: {}]   ;;  %s285_s2 = inlined_call_operand.vmem [shape: f32[1,128], index: 2, kind: input, shape index: {}]   ;;  %s286_s3 = inlined_call_operand.hbm [shape: f32[8,128], index: 3, kind: output, shape index: {}]  }
   0x1   :  { %9 = vsyncpa [#allocation6], 0 }
   0x2   :  { %10 = vsyncpa [#allocation4], 0  ;;  %s244_s12 = smov [#allocation2]   ;;  %s245_s14 = smov [#allocation5]  }
   0x3   :  { %s17_s13 = sshll.u32 %s244_s12, 4  ;;  %s26_s15 = sshll.u32 %s245_s14, 4  ;;  %s18_s13 = int_to_ptr.vmem [resolvable:$true] %s17_s13  ;;  %s27_s15 = int_to_ptr.vmem [resolvable:$true] %s26_s15 }
   0x4   :  { %s186_s16 = scalar_lea.vmem %s18_s13, 128  ;;  %p191_p1 = scmp.lt.s32.totalorder %s18_s13, %s18_s13 }
   0x5   :  { %p187_p0 = scmp.ne.s32.totalorder %s18_s13, %s186_s16  ;;  %p192_p2 = scmp.lt.s32.totalorder %s186_s16, %s186_s16 }
   0x7   :  { %p193_p3 = por %p192_p2, %p191_p1 }
   0x9   :  { %p194_p4 = pnand %p193_p3, %p187_p0 }
   0xb   :  { %197 = shalt.err (!%p194_p4)
}
   0xc   :  { %20 = dma.hbm_to_vmem [thread:$0]  %s283_s0, 128, %s18_s13, [#allocation3]  }
   0xd   :  { %s206_s19 = scalar_lea.vmem %s27_s15, 512  ;;  %p211_p6 = scmp.lt.s32.totalorder %s27_s15, %s27_s15 }
   0xe   :  { %p207_p5 = scmp.ne.s32.totalorder %s27_s15, %s206_s19  ;;  %p212_p7 = scmp.lt.s32.totalorder %s206_s19, %s206_s19 }
  0x10   :  { %p213_p8 = por %p212_p7, %p211_p6 }
  0x12   :  { %p214_p9 = pnand %p213_p8, %p207_p5 }
  0x14   :  { %217 = shalt.err (!%p214_p9)
}
  0x15   :  { %s246_s20 = smov 64   ;;  %s247_s21 = smov 4  }
  0x16   :  { %32 = dma.hbm_to_vmem [thread:$0]  %s284_s1, 512, %s27_s15, [#allocation6], %s246_s20, %s246_s20, %s247_s21  }
  0x17   :  { %238 = dma.done.wait [#allocation3], 128  }
  0x18   :  { %239 = vsyncadd [#allocation3], 4294967168 }
  0x19   :  { %240 = dma.done.wait [#allocation6], 512  }
  0x1a   :  { %241 = vsyncadd [#allocation6], 4294966784  ;;  %v248_v0 = vmov 0.0   ;;  %vm249_vm0 = vmmov 0   ;;  %v174_v1 = vld [vmem:[#allocation5 + $0x18] sm:$0xff]   ;;  %v175_v2 = vld [vmem:[#allocation5 + $0x10] sm:$0xff]  }
  0x1b   :  { %155 = vmatprep.subr.bf16.mxu0 %v248_v0  ;;  %163 = vmatprep.mubr.msk.bf16.mxu0 %vm249_vm0, %v248_v0  ;;  %v176_v3 = vld [vmem:[#allocation5 + $0x8] sm:$0xff]   ;;  %v177_v4 = vld [vmem:[#allocation5] sm:$0xff]   ;;  %v42_v5 = vld [vmem:[#allocation2] sm:$0xff]  ;;  %vm83_vm1 = vcmask 523264   ;;  %s250_s24 = smov [#allocation7]  }
  0x1c   :  { %156 = vmatpush3.bf16.msra.mxu0 %v174_v1  ;;  %v43_v6 = vpack.c.bf16 %v42_v5, %v42_v5  ;;  %v144_v7 = vld [vmem:[%s285_s2] ss:$0 sm:$0xff]  ;;  %s134_s25 = sshll.u32 %s250_s24, 4  ;;  %s135_s25 = int_to_ptr.vmem [resolvable:$true] %s134_s25 }
  0x1d   :  { %157 = vmatprep.subr.bf16.mxu0 %v248_v0  ;;  %s218_s26 = scalar_lea.vmem %s135_s25, 128  ;;  %p223_p11 = scmp.lt.s32.totalorder %s135_s25, %s135_s25 }
  0x1e   :  { %p219_p10 = scmp.ne.s32.totalorder %s135_s25, %s218_s26  ;;  %p224_p12 = scmp.lt.s32.totalorder %s218_s26, %s218_s26 }
  0x20   :  { %158 = vmatpush3.bf16.msra.mxu0 %v175_v2  ;;  %p225_p13 = por %p224_p12, %p223_p11 }
  0x21   :  { %159 = vmatprep.subr.bf16.mxu0 %v248_v0 }
  0x22   :  { %p226_p0 = pnand %p225_p13, %p219_p10 }
  0x24   :  { %160 = vmatpush3.bf16.msra.mxu0 %v176_v3 }
  0x25   :  { %161 = vmatprep.subr.bf16.mxu0 %v248_v0 }
  0x28   :  { %162 = vmatpush3.bf16.msra.mxu0 %v177_v4 }
  0x2b   :  { %164 = vmatmul.mubr.msk.bf16.vlgmr.msra.gmra.mxu0 %vm83_vm1, %v43_v6 }
  0xeb   :  { %v121_v8 = vpop.f32.mrf.mxu0 }
  0xec   :  { %v122_v9 = vadd.f32 %v144_v7, %v121_v8 }
  0xed   :  { %v165_v10 = vpop.f32.mrf.mxu0 }
  0xee   :  { %127 = vst [vmem:[#allocation7] sm:$0xff] %v122_v9 }
  0xef   :  { %v124_v11 = vpop.f32.mrf.mxu0 }
  0xf0   :  { %229 = shalt.err (!%p226_p0)
}
  0xf1   :  { %137 = dma.vmem_to_hbm [thread:$0]  %s135_s25, 128, %s286_s3, [#allocation4]   ;;  %v166_v12 = vpop.f32.mrf.mxu0 }
  0xf2   :  { %242 = dma.done.wait [#allocation4], 128  }
  0xf3   :  { %243 = vsyncadd [#allocation4], 4294967168 }
  0xf4   :  { %141 = vsyncpa [#allocation3], 1 }
  0xf5   :  { %142 = vsyncpa [#allocation6], 1 }
  0xf6   :  { %143 = vsyncpa [#allocation4], 1 }

</bundles_post_ra>
